<compile_context>
chip_gen: v5e
topology: v5e:2x2
jax: 0.10.0
libtpu: 0.0.40
codegen_flags: <defaults>
</compile_context>

<pallas_src>
import jax
import jax.numpy as jnp
from jax.experimental import pallas as pl
from jax.experimental.pallas import tpu as pltpu


def _round_up(a, b):
    return ((a + b - 1) // b) * b


_LANE = 128
_MIN_GRID_STEPS = 4               # >= 2 steps per TensorCore on v7x; harmless on v5e/v6e
_VMEM_BUDGET = 24 * 1024 * 1024   # well inside v7x's 32 MiB scoped / 64 MiB physical


def _vmem_bytes(tile_b, in_dim, hidden, out_dim, pattern_itemsize):
    f32 = 4
    # Weights/biases: constant index maps -> resident once (not re-fetched per step).
    weights = (in_dim * hidden + 2 * hidden * hidden + hidden * out_dim
               + 3 * hidden + out_dim) * f32
    # Per-grid-step streamed tiles are double-buffered by the Pallas pipeline.
    tiles = 2 * tile_b * ((in_dim + out_dim) * f32 + 3 * hidden * pattern_itemsize)
    # Live f32 (hidden, tile_b) activation intermediates (z/a) held in VMEM scratch.
    acts = 4 * hidden * tile_b * f32
    return weights + tiles + acts


def _make_mlp_kernel(in_dim, out_dim):
    def kernel(xT_ref,
               w1T_ref, b1T_ref, w2T_ref, b2T_ref,
               w3T_ref, b3T_ref, w4_ref, b4T_ref,
               outT_ref, p1T_ref, p2T_ref, p3T_ref):
        xT = xT_ref[...]                                     # (in_dim, tile_b), lane-dense

        # ---- fc1 + relu ----------------------------------------------------
        if in_dim == 1:
            # K == 1: outer-product broadcast on the VPU, skip the MXU entirely.
            z1 = w1T_ref[...] * xT + b1T_ref[...]            # (hidden, tile_b)
        else:
            z1 = jnp.dot(w1T_ref[...], xT,
                         preferred_element_type=jnp.float32) + b1T_ref[...]
        p1T_ref[...] = (z1 > 0).astype(p1T_ref.dtype)         # lane-dense int8 store
        a1 = jnp.maximum(z1, 0.0)

        # ---- fc2 + sigmoid ---------------------------------------------------
        z2 = jnp.dot(w2T_ref[...], a1,
                     preferred_element_type=jnp.float32) + b2T_ref[...]
        p2T_ref[...] = (z2 > 0).astype(p2T_ref.dtype)
        a2 = pl.reciprocal(1.0 + jnp.exp(-z2), approx=True)   # exp + vrcp both on the EUP

        # ---- fc3 + relu ---------------------------------------------------------
        z3 = jnp.dot(w3T_ref[...], a2,
                     preferred_element_type=jnp.float32) + b3T_ref[...]
        p3T_ref[...] = (z3 > 0).astype(p3T_ref.dtype)
        a3 = jnp.maximum(z3, 0.0)

        # ---- fc4 (no activation) --------------------------------------------------
        if out_dim == 1:
            # N == 1: VPU multiply + sublane reduction (XLU) instead of a degenerate MXU call.
            z4 = jnp.sum(w4_ref[...] * a3, axis=0, keepdims=True) + b4T_ref[...]
        else:
            z4 = jnp.dot(w4_ref[...], a3,
                         preferred_element_type=jnp.float32) + b4T_ref[...]
        outT_ref[...] = z4.astype(outT_ref.dtype)

    return kernel


def net_forward(x, params, return_patterns=False, tile_b=4096,
                pattern_dtype=jnp.int8, patterns_batch_major=True):
    """Forward pass of the 4-layer MLP (PyTorch `Net` semantics).

    x: (N, input_layer) float32.
    params: dict with w1..w4 stored as (in_features, out_features) and
            b1..b4 stored as (1, out_features).
    pattern_dtype: dtype of the 0/1 activation-pattern outputs. int8 (default)
      minimizes HBM writeback; pass jnp.int32 for exact PyTorch `.int()` dtype.
    patterns_batch_major: if True, patterns are returned (N, hidden) like the
      PyTorch module (one cheap XLA transpose outside the kernel); if False,
      they are returned in the kernel's lane-dense (hidden, N) layout.
    """
    n, in_dim = x.shape
    hidden = params["w1"].shape[1]
    out_dim = params["w4"].shape[1]
    pat_isz = jnp.dtype(pattern_dtype).itemsize

    # Batch tile: multiple of 128 (batch rows sit on the lane axis), capped so
    # the grid keeps >= _MIN_GRID_STEPS steps (both v7x TCs get work), then
    # shrunk against the VMEM budget (matters first on v7x's smaller VMEM).
    grid_cap = _round_up(max((n + _MIN_GRID_STEPS - 1) // _MIN_GRID_STEPS, 1), _LANE)
    tile_b = int(min(max(int(tile_b), _LANE), grid_cap))
    tile_b = _round_up(tile_b, _LANE)
    while (tile_b > _LANE and
           _vmem_bytes(tile_b, in_dim, hidden, out_dim, pat_isz) > _VMEM_BUDGET):
        tile_b = max(_LANE, _round_up(tile_b // 2, _LANE))

    n_pad = _round_up(n, tile_b)
    grid = (n_pad // tile_b,)

    # Feature-major layout: batch on lanes.
    xT = x.T                                        # (in_dim, N)
    if n_pad != n:
        xT = jnp.pad(xT, ((0, 0), (0, n_pad - n)))

    w1T = params["w1"].T                            # (hidden, in_dim)
    w2T = params["w2"].T                            # (hidden, hidden)
    w3T = params["w3"].T                            # (hidden, hidden)
    w4_arg = params["w4"] if out_dim == 1 else params["w4"].T
    b1T = params["b1"].T                            # (hidden, 1)
    b2T = params["b2"].T
    b3T = params["b3"].T
    b4T = params["b4"].T                            # (out_dim, 1)

    batch_spec = lambda d: pl.BlockSpec((d, tile_b), lambda i: (0, i))
    const_spec = lambda shape: pl.BlockSpec(shape, lambda i: (0, 0))

    out_shapes = (
        jax.ShapeDtypeStruct((out_dim, n_pad), jnp.float32),    # x4^T
        jax.ShapeDtypeStruct((hidden, n_pad), pattern_dtype),   # p1^T
        jax.ShapeDtypeStruct((hidden, n_pad), pattern_dtype),   # p2^T
        jax.ShapeDtypeStruct((hidden, n_pad), pattern_dtype),   # p3^T
    )

    x4T, p1T, p2T, p3T = pl.pallas_call(
        _make_mlp_kernel(in_dim, out_dim),
        out_shape=out_shapes,
        grid=grid,
        in_specs=[
            batch_spec(in_dim),                                   # x^T tile (lane-dense)
            const_spec(w1T.shape), const_spec(b1T.shape),
            const_spec(w2T.shape), const_spec(b2T.shape),
            const_spec(w3T.shape), const_spec(b3T.shape),
            const_spec(w4_arg.shape), const_spec(b4T.shape),
        ],
        out_specs=(
            batch_spec(out_dim),
            batch_spec(hidden), batch_spec(hidden), batch_spec(hidden),
        ),
        compiler_params=pltpu.CompilerParams(
            dimension_semantics=("parallel",),   # shard batch tiles over v7x's 2 TCs
            vmem_limit_bytes=32 * 1024 * 1024,
        ),
    )(
        xT,
        w1T, b1T, w2T, b2T, w3T, b3T, w4_arg, b4T,
    )

    # x4 back to (N, out_dim).  For out_dim == 1 the reshape is layout-free
    # ((1, n_pad) row-major is the same memory as (n_pad, 1)).
    if out_dim == 1:
        x4 = x4T.reshape(n_pad, 1)[:n]
    else:
        x4 = x4T.T[:n]

    if not return_patterns:
        return x4

    if patterns_batch_major:
        patterns = [pT.T[:n] for pT in (p1T, p2T, p3T)]
    else:
        patterns = [pT[:, :n] for pT in (p1T, p2T, p3T)]
    return x4, patterns


def init_params(key, input_layer, hidden_layer, output_layer):
    """Deterministic init mimicking nn.Linear's U(-1/sqrt(fan_in), 1/sqrt(fan_in)).
    Weights stored transposed vs. PyTorch: (in_features, out_features)."""
    def linear(key, fan_in, fan_out):
        kw, kb = jax.random.split(key)
        bound = 1.0 / jnp.sqrt(jnp.float32(fan_in))
        w = jax.random.uniform(kw, (fan_in, fan_out), jnp.float32, -bound, bound)
        b = jax.random.uniform(kb, (1, fan_out), jnp.float32, -bound, bound)
        return w, b

    k1, k2, k3, k4 = jax.random.split(key, 4)
    w1, b1 = linear(k1, input_layer, hidden_layer)
    w2, b2 = linear(k2, hidden_layer, hidden_layer)
    w3, b3 = linear(k3, hidden_layer, hidden_layer)
    w4, b4 = linear(k4, hidden_layer, output_layer)
    return dict(w1=w1, b1=b1, w2=w2, b2=b2, w3=w3, b3=b3, w4=w4, b4=b4)


def _reference(x, p):
    """Pure-JAX reference (mirrors the PyTorch forward, exact sigmoid)."""
    z1 = x @ p["w1"] + p["b1"]; p1 = (z1 > 0).astype(jnp.int32); a1 = jnp.maximum(z1, 0.0)
    z2 = a1 @ p["w2"] + p["b2"]; p2 = (z2 > 0).astype(jnp.int32); a2 = 1.0 / (1.0 + jnp.exp(-z2))
    z3 = a2 @ p["w3"] + p["b3"]; p3 = (z3 > 0).astype(jnp.int32); a3 = jnp.maximum(z3, 0.0)
    z4 = a3 @ p["w4"] + p["b4"]
    return z4, [p1, p2, p3]


if __name__ == "__main__":
    input_layer, hidden_layer, output_layer = 1, 32, 1
    batch = 200   # matches torch.linspace(-2, 2, 200) in the original script

    key = jax.random.PRNGKey(0)
    params = init_params(key, input_layer, hidden_layer, output_layer)

    x = jnp.linspace(-2.0, 2.0, batch, dtype=jnp.float32).reshape(-1, 1)

    # With batch=200 the tile logic picks tile_b=128 -> n_pad=256 -> 2 grid steps,
    # so the demo still exercises a real multi-step pipelined grid.
    y, patterns = net_forward(x, params, return_patterns=True)
    y = jax.block_until_ready(y)
    for p in patterns:
        jax.block_until_ready(p)

    y_ref, patterns_ref = _reference(x, params)
    assert y.shape == (batch, output_layer)
    # Loose-but-meaningful tolerance: the sigmoid uses the EUP approx reciprocal.
    assert jnp.allclose(y, y_ref, atol=2e-3, rtol=2e-3), "fc4 output mismatch"
    for p, p_ref in zip(patterns, patterns_ref):
        assert p.shape == (batch, hidden_layer) and p.dtype == jnp.int8
        # allow the (measure-zero) chance of a sign flip exactly at z == 0
        assert float(jnp.mean((p == p_ref).astype(jnp.float32))) > 0.999

    print("KERNEL_OK")
</pallas_src>

<mosaic_0001>
module attributes {stable_mosaic.version = 11 : i64} {
  func.func @kernel(%arg0: i32, %arg1: memref<1x128xf32, #tpu.memory_space<vmem>>, %arg2: memref<32x1xf32, #tpu.memory_space<vmem>>, %arg3: memref<32x1xf32, #tpu.memory_space<vmem>>, %arg4: memref<32x32xf32, #tpu.memory_space<vmem>>, %arg5: memref<32x1xf32, #tpu.memory_space<vmem>>, %arg6: memref<32x32xf32, #tpu.memory_space<vmem>>, %arg7: memref<32x1xf32, #tpu.memory_space<vmem>>, %arg8: memref<32x1xf32, #tpu.memory_space<vmem>>, %arg9: memref<1x1xf32, #tpu.memory_space<vmem>>, %arg10: memref<1x128xf32, #tpu.memory_space<vmem>>, %arg11: memref<32x128xi8, #tpu.memory_space<vmem>>, %arg12: memref<32x128xi8, #tpu.memory_space<vmem>>, %arg13: memref<32x128xi8, #tpu.memory_space<vmem>>) attributes {dimension_semantics = [#tpu.dimension_semantics<parallel>], iteration_bounds = array<i64: 2>, scalar_prefetch = 0 : i64, scratch_operands = 0 : i64, tpu.core_type = #tpu.core_type<tc>, window_params = [{transform_indices = @transform_0, window_bounds = array<i64: 1, 128>}, {pipeline_mode = #tpu.pipeline_mode<synchronous>, transform_indices = @transform_1, window_bounds = array<i64: 32, 1>}, {pipeline_mode = #tpu.pipeline_mode<synchronous>, transform_indices = @transform_2, window_bounds = array<i64: 32, 1>}, {pipeline_mode = #tpu.pipeline_mode<synchronous>, transform_indices = @transform_3, window_bounds = array<i64: 32, 32>}, {pipeline_mode = #tpu.pipeline_mode<synchronous>, transform_indices = @transform_4, window_bounds = array<i64: 32, 1>}, {pipeline_mode = #tpu.pipeline_mode<synchronous>, transform_indices = @transform_5, window_bounds = array<i64: 32, 32>}, {pipeline_mode = #tpu.pipeline_mode<synchronous>, transform_indices = @transform_6, window_bounds = array<i64: 32, 1>}, {pipeline_mode = #tpu.pipeline_mode<synchronous>, transform_indices = @transform_7, window_bounds = array<i64: 32, 1>}, {pipeline_mode = #tpu.pipeline_mode<synchronous>, transform_indices = @transform_8, window_bounds = array<i64: 1, 1>}, {transform_indices = @transform_9, window_bounds = array<i64: 1, 128>}, {transform_indices = @transform_10, window_bounds = array<i64: 32, 128>}, {transform_indices = @transform_11, window_bounds = array<i64: 32, 128>}, {transform_indices = @transform_12, window_bounds = array<i64: 32, 128>}]} {
    %c0 = arith.constant 0 : index
    %c0_0 = arith.constant 0 : index
    %0 = vector.load %arg1[%c0, %c0_0] : memref<1x128xf32, #tpu.memory_space<vmem>>, vector<1x128xf32>
    %c0_1 = arith.constant 0 : index
    %c0_2 = arith.constant 0 : index
    %1 = vector.load %arg2[%c0_1, %c0_2] : memref<32x1xf32, #tpu.memory_space<vmem>>, vector<32x1xf32>
    %2 = vector.broadcast %1 : vector<32x1xf32> to vector<32x128xf32>
    %3 = vector.broadcast %0 : vector<1x128xf32> to vector<32x128xf32>
    %4 = arith.mulf %2, %3 : vector<32x128xf32>
    %c0_3 = arith.constant 0 : index
    %c0_4 = arith.constant 0 : index
    %5 = vector.load %arg3[%c0_3, %c0_4] : memref<32x1xf32, #tpu.memory_space<vmem>>, vector<32x1xf32>
    %6 = vector.broadcast %5 : vector<32x1xf32> to vector<32x128xf32>
    %7 = arith.addf %4, %6 : vector<32x128xf32>
    %cst = arith.constant 0.000000e+00 : f32
    %8 = vector.broadcast %cst : f32 to vector<32x128xf32>
    %9 = arith.cmpf ogt, %7, %8 : vector<32x128xf32>
    %10 = arith.extui %9 : vector<32x128xi1> to vector<32x128xi8>
    %c0_5 = arith.constant 0 : index
    %c0_6 = arith.constant 0 : index
    %11 = vector.load %arg11[%c0_5, %c0_6] : memref<32x128xi8, #tpu.memory_space<vmem>>, vector<32x128xi8>
    tpu.vector_store %arg11[%c0_5, %c0_6], %10 {strides = array<i32>} : memref<32x128xi8, #tpu.memory_space<vmem>>, vector<32x128xi8>,
    %cst_7 = arith.constant 0.000000e+00 : f32
    %12 = vector.broadcast %cst_7 : f32 to vector<32x128xf32>
    %13 = arith.maximumf %7, %12 : vector<32x128xf32>
    %c0_8 = arith.constant 0 : index
    %c0_9 = arith.constant 0 : index
    %14 = vector.load %arg4[%c0_8, %c0_9] : memref<32x32xf32, #tpu.memory_space<vmem>>, vector<32x32xf32>
    %cst_10 = arith.constant dense<0.000000e+00> : vector<32x128xf32>
    %15 = tpu.matmul %14, %13, %cst_10 {dimension_numbers = #tpu.dot_dimension_numbers<[1], [0], [0], [1], [0, 0, 1, 1], [], []>} : vector<32x32xf32>, vector<32x128xf32>, vector<32x128xf32> -> vector<32x128xf32>
    %c0_11 = arith.constant 0 : index
    %c0_12 = arith.constant 0 : index
    %16 = vector.load %arg5[%c0_11, %c0_12] : memref<32x1xf32, #tpu.memory_space<vmem>>, vector<32x1xf32>
    %17 = vector.broadcast %16 : vector<32x1xf32> to vector<32x128xf32>
    %18 = arith.addf %15, %17 : vector<32x128xf32>
    %cst_13 = arith.constant 0.000000e+00 : f32
    %19 = vector.broadcast %cst_13 : f32 to vector<32x128xf32>
    %20 = arith.cmpf ogt, %18, %19 : vector<32x128xf32>
    %21 = arith.extui %20 : vector<32x128xi1> to vector<32x128xi8>
    %c0_14 = arith.constant 0 : index
    %c0_15 = arith.constant 0 : index
    %22 = vector.load %arg12[%c0_14, %c0_15] : memref<32x128xi8, #tpu.memory_space<vmem>>, vector<32x128xi8>
    tpu.vector_store %arg12[%c0_14, %c0_15], %21 {strides = array<i32>} : memref<32x128xi8, #tpu.memory_space<vmem>>, vector<32x128xi8>,
    %cst_16 = arith.constant 0.000000e+00 : f32
    %23 = vector.broadcast %cst_16 : f32 to vector<32x128xf32>
    %24 = arith.subf %23, %18 : vector<32x128xf32>
    %25 = math.exp %24 : vector<32x128xf32>
    %cst_17 = arith.constant 1.000000e+00 : f32
    %26 = vector.broadcast %cst_17 : f32 to vector<32x128xf32>
    %27 = arith.addf %26, %25 : vector<32x128xf32>
    %28 = tpu.reciprocal %27 {approx = true} : vector<32x128xf32> -> vector<32x128xf32>
    %c0_18 = arith.constant 0 : index
    %c0_19 = arith.constant 0 : index
    %29 = vector.load %arg6[%c0_18, %c0_19] : memref<32x32xf32, #tpu.memory_space<vmem>>, vector<32x32xf32>
    %cst_20 = arith.constant dense<0.000000e+00> : vector<32x128xf32>
    %30 = tpu.matmul %29, %28, %cst_20 {dimension_numbers = #tpu.dot_dimension_numbers<[1], [0], [0], [1], [0, 0, 1, 1], [], []>} : vector<32x32xf32>, vector<32x128xf32>, vector<32x128xf32> -> vector<32x128xf32>
    %c0_21 = arith.constant 0 : index
    %c0_22 = arith.constant 0 : index
    %31 = vector.load %arg7[%c0_21, %c0_22] : memref<32x1xf32, #tpu.memory_space<vmem>>, vector<32x1xf32>
    %32 = vector.broadcast %31 : vector<32x1xf32> to vector<32x128xf32>
    %33 = arith.addf %30, %32 : vector<32x128xf32>
    %cst_23 = arith.constant 0.000000e+00 : f32
    %34 = vector.broadcast %cst_23 : f32 to vector<32x128xf32>
    %35 = arith.cmpf ogt, %33, %34 : vector<32x128xf32>
    %36 = arith.extui %35 : vector<32x128xi1> to vector<32x128xi8>
    %c0_24 = arith.constant 0 : index
    %c0_25 = arith.constant 0 : index
    %37 = vector.load %arg13[%c0_24, %c0_25] : memref<32x128xi8, #tpu.memory_space<vmem>>, vector<32x128xi8>
    tpu.vector_store %arg13[%c0_24, %c0_25], %36 {strides = array<i32>} : memref<32x128xi8, #tpu.memory_space<vmem>>, vector<32x128xi8>,
    %cst_26 = arith.constant 0.000000e+00 : f32
    %38 = vector.broadcast %cst_26 : f32 to vector<32x128xf32>
    %39 = arith.maximumf %33, %38 : vector<32x128xf32>
    %c0_27 = arith.constant 0 : index
    %c0_28 = arith.constant 0 : index
    %40 = vector.load %arg8[%c0_27, %c0_28] : memref<32x1xf32, #tpu.memory_space<vmem>>, vector<32x1xf32>
    %41 = vector.broadcast %40 : vector<32x1xf32> to vector<32x128xf32>
    %42 = arith.mulf %41, %39 : vector<32x128xf32>
    %cst_29 = arith.constant dense<0.000000e+00> : vector<128xf32>
    %43 = vector.multi_reduction <add>, %42, %cst_29 [0] : vector<32x128xf32> to vector<128xf32>
    %44 = vector.shape_cast %43 : vector<128xf32> to vector<1x128xf32>
    %c0_30 = arith.constant 0 : index
    %c0_31 = arith.constant 0 : index
    %45 = vector.load %arg9[%c0_30, %c0_31] : memref<1x1xf32, #tpu.memory_space<vmem>>, vector<1x1xf32>
    %46 = vector.broadcast %45 : vector<1x1xf32> to vector<1x128xf32>
    %47 = arith.addf %44, %46 : vector<1x128xf32>
    %c0_32 = arith.constant 0 : index
    %c0_33 = arith.constant 0 : index
    %48 = vector.load %arg10[%c0_32, %c0_33] : memref<1x128xf32, #tpu.memory_space<vmem>>, vector<1x128xf32>
    tpu.vector_store %arg10[%c0_32, %c0_33], %47 {strides = array<i32>} : memref<1x128xf32, #tpu.memory_space<vmem>>, vector<1x128xf32>,
    return
  }
  func.func @transform_0(%arg0: i32) -> (i32, i32) {
    %c0_i32 = arith.constant 0 : i32
    %c0_i32_0 = arith.constant 0 : i32
    return %c0_i32, %arg0 : i32, i32
  }
  func.func @transform_1(%arg0: i32) -> (i32, i32) {
    %c0_i32 = arith.constant 0 : i32
    %c0_i32_0 = arith.constant 0 : i32
    %c0_i32_1 = arith.constant 0 : i32
    return %c0_i32, %c0_i32_0 : i32, i32
  }
  func.func @transform_2(%arg0: i32) -> (i32, i32) {
    %c0_i32 = arith.constant 0 : i32
    %c0_i32_0 = arith.constant 0 : i32
    %c0_i32_1 = arith.constant 0 : i32
    return %c0_i32, %c0_i32_0 : i32, i32
  }
  func.func @transform_3(%arg0: i32) -> (i32, i32) {
    %c0_i32 = arith.constant 0 : i32
    %c0_i32_0 = arith.constant 0 : i32
    %c0_i32_1 = arith.constant 0 : i32
    return %c0_i32, %c0_i32_0 : i32, i32
  }
  func.func @transform_4(%arg0: i32) -> (i32, i32) {
    %c0_i32 = arith.constant 0 : i32
    %c0_i32_0 = arith.constant 0 : i32
    %c0_i32_1 = arith.constant 0 : i32
    return %c0_i32, %c0_i32_0 : i32, i32
  }
  func.func @transform_5(%arg0: i32) -> (i32, i32) {
    %c0_i32 = arith.constant 0 : i32
    %c0_i32_0 = arith.constant 0 : i32
    %c0_i32_1 = arith.constant 0 : i32
    return %c0_i32, %c0_i32_0 : i32, i32
  }
  func.func @transform_6(%arg0: i32) -> (i32, i32) {
    %c0_i32 = arith.constant 0 : i32
    %c0_i32_0 = arith.constant 0 : i32
    %c0_i32_1 = arith.constant 0 : i32
    return %c0_i32, %c0_i32_0 : i32, i32
  }
  func.func @transform_7(%arg0: i32) -> (i32, i32) {
    %c0_i32 = arith.constant 0 : i32
    %c0_i32_0 = arith.constant 0 : i32
    %c0_i32_1 = arith.constant 0 : i32
    return %c0_i32, %c0_i32_0 : i32, i32
  }
  func.func @transform_8(%arg0: i32) -> (i32, i32) {
    %c0_i32 = arith.constant 0 : i32
    %c0_i32_0 = arith.constant 0 : i32
    %c0_i32_1 = arith.constant 0 : i32
    return %c0_i32, %c0_i32_0 : i32, i32
  }
  func.func @transform_9(%arg0: i32) -> (i32, i32) {
    %c0_i32 = arith.constant 0 : i32
    %c0_i32_0 = arith.constant 0 : i32
    return %c0_i32, %arg0 : i32, i32
  }
  func.func @transform_10(%arg0: i32) -> (i32, i32) {
    %c0_i32 = arith.constant 0 : i32
    %c0_i32_0 = arith.constant 0 : i32
    return %c0_i32, %arg0 : i32, i32
  }
  func.func @transform_11(%arg0: i32) -> (i32, i32) {
    %c0_i32 = arith.constant 0 : i32
    %c0_i32_0 = arith.constant 0 : i32
    return %c0_i32, %arg0 : i32, i32
  }
  func.func @transform_12(%arg0: i32) -> (i32, i32) {
    %c0_i32 = arith.constant 0 : i32
    %c0_i32_0 = arith.constant 0 : i32
    return %c0_i32, %arg0 : i32, i32
  }
}

</mosaic_0001>

<bundles_post_ra>
// kernel: tpu_custom_call.1
= control target key start
LH: loop header
LB: loop body
LE: loop exit
PB: predicated region body
PF: predicated region fallthrough
CT: control target
= control target key end

     0   :  { %s1565_s0 = inlined_call_operand.vmem [shape: f32[1,256], index: 0, kind: input, shape index: {}]   ;;  %s1566_s1 = inlined_call_operand.vmem [shape: f32[32,1], index: 1, kind: input, shape index: {}]   ;;  %s1567_s2 = inlined_call_operand.vmem [shape: f32[32,1], index: 2, kind: input, shape index: {}]   ;;  %s1568_s3 = inlined_call_operand.vmem [shape: f32[32,32], index: 3, kind: input, shape index: {}]   ;;  %s1569_s4 = inlined_call_operand.vmem [shape: f32[32,1], index: 4, kind: input, shape index: {}]   ;;  %s1570_s5 = inlined_call_operand.vmem [shape: f32[32,32], index: 5, kind: input, shape index: {}]   ;;  %s1571_s6 = inlined_call_operand.vmem [shape: f32[32,1], index: 6, kind: input, shape index: {}]   ;;  %s1572_s7 = inlined_call_operand.vmem [shape: f32[32,1], index: 7, kind: input, shape index: {}]   ;;  %s1573_s8 = inlined_call_operand.<no memory space> [shape: f32[1,1], index: 8, kind: input, shape index: {}]   ;;  %s1574_s9 = inlined_call_operand.hbm [shape: f32[1,256], index: 9, kind: output, shape index: {0}]   ;;  %s1575_s10 = inlined_call_operand.hbm [shape: s8[32,256], index: 10, kind: output, shape index: {1}]   ;;  %s1576_s11 = inlined_call_operand.hbm [shape: s8[32,256], index: 11, kind: output, shape index: {2}]   ;;  %s1577_s12 = inlined_call_operand.hbm [shape: s8[32,256], index: 12, kind: output, shape index: {3}]  }
   0x1   :  { %1581 = sst [smem:[#allocation15_spill]] %s1565_s0  ;;  %v18_v0 = vstv %s1573_s8 }
   0x2   :  { %1582 = sst [smem:[#allocation16_spill]] %s1566_s1  ;;  %19 = vst [vmem:[#allocation2] sm:$0x1] %v18_v0 }
   0x3   :  { %1583 = sst [smem:[#allocation17_spill]] %s1567_s2 }
   0x4   :  { %1584 = sst [smem:[#allocation18_spill]] %s1568_s3 }
   0x5   :  { %1585 = sst [smem:[#allocation19_spill]] %s1569_s4 }
   0x6   :  { %20 = vsyncpa [#allocation4], 0 }
   0x7   :  { %22 = vsyncpa [#allocation4 + $0x1], 0 }
   0x8   :  { %23 = vsyncpa [#allocation6], 0 }
   0x9   :  { %25 = vsyncpa [#allocation6 + $0x1], 0 }
   0xa   :  { %26 = vsyncpa [#allocation9], 0 }
   0xb   :  { %28 = vsyncpa [#allocation9 + $0x1], 0  ;;  %s1295_s23 = smov 0   ;;  %s1297_s24 = smov 0  }
   0xc   :  { %s1299_s25 = smov 0   ;;  %s1301_s26 = smov 0  }
   0xd LB: > { %1586 = sst [smem:[#allocation13_spill]] %s1220_s25  ;;  %s1316_s8 = sadd.s32 4294967295, %s1224_s26   ;;  %s1224_s26 = sphi %s1301_s26, %s1601_s26   ;;  %s1220_s25 = sphi %s1299_s25, %s1598_s25   ;;  %s1216_s24 = sphi %s1297_s24, %s1600_s24   ;;  %s1212_s23 = sphi %s1295_s23, %s1599_s23  }
   0xe   : > { %s1578_s27 = sadd.s32 4294967294, %s1224_s26   ;;  %s1320_s28 = sadd.s32 1, %s1224_s26  }
   0xf   : > { %s235_s29 = sadd.s32 1, %s1220_s25  ;;  %s232_s30 = ssub.s32 %s1224_s26, %s1320_s28 }
  0x10   : > { %p245_p0 = scmp.ne.s32.totalorder %s1220_s25, %s1216_s24  ;;  %p233_p1 = scmp.eq.s32.totalorder %s232_s30, 0 }
  0x11   : > { %p246_p2 = scmp.eq.s32.totalorder %s1316_s8, 1  ;;  %p251_p3 = scmp.ne.s32.totalorder %s1216_s24, %s1212_s23 }
  0x12   : > { %p252_p4 = scmp.eq.s32.totalorder %s1578_s27, 1  ;;  %p967_p7 = scmp.ge.s32.totalorder %s1224_s26, 1 }
  0x13   : > { %s1333_s13 = scalar_select %p233_p1, %s1220_s25, %s235_s29  }
  0x14   : > { %p1335_p5 = por %p246_p2, %p245_p0  ;;  %p1339_p6 = por %p252_p4, %p251_p3 }
  0x15   : > { %1587 = sst [smem:[#allocation14_spill]] %s1333_s13  ;;  %p378_p8 = scmp.lt.s32.totalorder %s1224_s26, 3 }
  0x17   : > { %p379_p9 = pnand %p967_p7, %p378_p8 }
  0x18   : > { %s1590_s2 = sld [smem:[#allocation17_spill]] (!%p379_p9)  ;;  %p432_p10 = scmp.lt.s32.totalorder (!%p379_p9), %s1316_s8, 1 }
  0x19   : > { %382 = sbr.rel (%p379_p9) target bundleno = 507 (0x1fb), region = 56  ;;  %s1591_s1 = sld [smem:[#allocation16_spill]] (!%p379_p9) }
  0x1a   : > { %s1592_s0 = sld [smem:[#allocation15_spill]] (!%p379_p9)  ;;  %s1473_s25 = sshll.u32 (!%p379_p9), %s1316_s8, 3 }
  0x1b   : > { %s1593_s4 = sld [smem:[#allocation19_spill]] (!%p379_p9) }
  0x1c   : > { %s1594_s3 = sld [smem:[#allocation18_spill]] (!%p379_p9) }
  0x1e   : > { %v471_v1 = vld [vmem:[%s1590_s2 + $0x10] sm:$0xff]  ;;  %v472_v2 = vld [vmem:[%s1590_s2 + $0x18] sm:$0xff]  ;;  %v1226_v4 = vmov 0   ;;  %s1359_s22 = scalar_select %p432_p10, %s1316_s8, 1  ;;  %v470_v9 = vld [vmem:[%s1590_s2 + $0x8] sm:$0xff]  ;;  %vm541_vm6 = vcmask 261120  }
  0x1f   : > { %v441_v3 = vld [vmem:[%s1591_s1 + $0x18] sm:$0xff]  ;;  %1052 = vset.pattern.permute.xlu2 %v1226_v4  ;;  %1051 = vset.pattern.permute.xlu1 %v1226_v4  ;;  %v438_v5 = vld [vmem:[%s1591_s1] sm:$0xff]  ;;  %v440_v6 = vld [vmem:[%s1591_s1 + $0x10] sm:$0xff] }
  0x20   : > { %1050 = vset.pattern.permute.xlu0 %v1226_v4  ;;  %485 = vperm.xlu2 %1052, %v471_v1   ;;  %s434_s16 = scalar_lea.vmem %s1592_s0, %s1359_s22  ;;  %v439_v7 = vld [vmem:[%s1591_s1 + $0x8] sm:$0xff]  ;;  %v469_v10 = vld [vmem:[%s1590_s2] sm:$0xff]  ;;  %v621_v14 = vld [vmem:[%s1571_s6 + $0x10] sm:$0xff]  ;;  %s1422_s22 = sand.u32 1, %s1216_s24  }
  0x21   : > { %490 = vperm.xlu1 %1051, %v472_v2   ;;  %459 = vperm.xlu0 %1050, %v441_v3   ;;  %v520_v8 = vld [vmem:[%s1593_s4 + $0x18] sm:$0xff]  ;;  %v517_v11 = vld [vmem:[%s1593_s4] sm:$0xff]  ;;  %v519_v12 = vld [vmem:[%s1593_s4 + $0x10] sm:$0xff]  ;;  %s1428_s13 = sshll.u32 %s1422_s22, 3 }
  0x22   : > { %v518_v13 = vld [vmem:[%s1593_s4 + $0x8] sm:$0xff]  ;;  %v619_v15 = vld [vmem:[%s1571_s6] sm:$0xff]  ;;  %v622_v18 = vld [vmem:[%s1571_s6 + $0x18] sm:$0xff]  ;;  %s417_s17 = scalar_lea.vmem [#allocation5], %s1428_s13  ;;  %s1580_s21 = scalar_lea.vmem [#allocation7], %s1428_s13 }
  0x23   : > { %v620_v16 = vld [vmem:[%s1571_s6 + $0x8] sm:$0xff]  ;;  %v700_v19 = vld [vmem:[%s1572_s7] sm:$0xff]  ;;  %v702_v21 = vld [vmem:[%s1572_s7 + $0x10] sm:$0xff]  ;;  %s786_s18 = sshll.u32 %s417_s17, 4  ;;  %s787_s18 = int_to_ptr.vmem [resolvable:$true] %s786_s18 }
  0x24   : > { %v701_v17 = vld [vmem:[%s1572_s7 + $0x8] sm:$0xff]  ;;  %v737_v20 = vld [vmem:[#allocation2] sm:$0x1]  ;;  %v703_v22 = vld [vmem:[%s1572_s7 + $0x18] sm:$0xff] }
  0x25   : > { %v1053_v23 = vld [vmem:[%s434_s16] ss:$0 sm:$0xff]  ;;  %v515_v47 = vld [vmem:[%s1594_s3 + $0x10] sm:$0xff]  ;;  %v514_v50 = vld [vmem:[%s1594_s3 + $0x8] sm:$0xff]  ;;  %s750_s16 = sand.u32 1, %s1316_s8  }
  0x26   : > { %v513_v43 = vld [vmem:[%s1594_s3] sm:$0xff]  ;;  %v516_v51 = vld [vmem:[%s1594_s3 + $0x18] sm:$0xff]  ;;  %s1481_s19 = scalar_lea.sflag [#allocation6], %s750_s16  ;;  %s1090_s3 = scalar_lea.hbm %s1575_s10, 16 }
  0x28   : > { %444 = vperm.xlu2 %1052, %v438_v5  }
  0x29   : > { %454 = vperm.xlu0 %1050, %v440_v6   ;;  %449 = vperm.xlu1 %1051, %v439_v7  }
  0x30   : > { %538 = vperm.xlu2 %1052, %v520_v8  }
  0x31   : > { %480 = vperm.xlu0 %1050, %v470_v9   ;;  %475 = vperm.xlu1 %1051, %v469_v10  }
  0x38   : > { %523 = vperm.xlu2 %1052, %v517_v11  }
  0x39   : > { %533 = vperm.xlu0 %1050, %v519_v12   ;;  %528 = vperm.xlu1 %1051, %v518_v13  }
  0x40   : > { %635 = vperm.xlu2 %1052, %v621_v14  }
  0x41   : > { %625 = vperm.xlu0 %1050, %v619_v15   ;;  %630 = vperm.xlu1 %1051, %v620_v16  }
  0x48   : > { %711 = vperm.xlu2 %1052, %v701_v17  }
  0x49   : > { %640 = vperm.xlu0 %1050, %v622_v18   ;;  %706 = vperm.xlu1 %1051, %v700_v19  }
  0x50   : > { %740 = vperm.xlu2 %1052, %v737_v20  }
  0x51   : > { %716 = vperm.xlu0 %1050, %v702_v21   ;;  %721 = vperm.xlu1 %1051, %v703_v22  }
  0x7a   : > { %v486_v28 = vpop.permute.xlu2 %485 }
  0x82   : > { %v445_v35 = vpop.permute.xlu2 %444 }
  0x83   : > { %v465_v36 = vmul.f32 %v1053_v23, %v445_v35 }
  0x8a   : > { %v539_v52 = vpop.permute.xlu2 %538 }
  0x92   : > { %v524_v59 = vpop.permute.xlu2 %523 }
  0x93   : > { %v491_v24 = vpop.permute.xlu1 %490  ;;  %v460_v25 = vpop.permute.xlu0 %459 }
  0x94   : > { %v468_v26 = vmul.f32 %v1053_v23, %v460_v25  ;;  %v617_v25 = vld [vmem:[%s1570_s5 + $0x10] sm:$0xff] }
  0x96   : > { %v496_v27 = vadd.f32 %v491_v24, %v468_v26  ;;  %v615_v24 = vld [vmem:[%s1570_s5] sm:$0xff] }
  0x98   : > { %v512_v29 = vmax.f32 %v496_v27, 0.0  ;;  %vm500_vm1 = vcmp.gt.f32.partialorder %v496_v27, 0.0  ;;  %v616_v27 = vld [vmem:[%s1570_s5 + $0x8] sm:$0xff] }
  0x9a   : > { %566 = vmatpush.msra.mxu0 %v512_v29  ;;  %987 = vmatpush.msra.mxu2 %v512_v29 }
  0x9b   : > { %v455_v30 = vpop.permute.xlu0 %454  ;;  %v450_v31 = vpop.permute.xlu1 %449 }
  0x9c   : > { %v467_v32 = vmul.f32 %v1053_v23, %v455_v30  ;;  %v466_v37 = vmul.f32 %v1053_v23, %v450_v31 }
  0x9e   : > { %v495_v33 = vadd.f32 %v486_v28, %v467_v32  ;;  %v618_v28 = vld [vmem:[%s1570_s5 + $0x18] sm:$0xff] }
  0xa0   : > { %v511_v34 = vmax.f32 %v495_v33, 0.0  ;;  %vm499_vm0 = vcmp.gt.f32.partialorder %v495_v33, 0.0 }
  0xa1   : > { %vm502_vm2 = vmpackc.low %vm500_vm1, %vm499_vm0 }
  0xa2   : > { %567 = vmatpush.msra.mxu0 %v511_v34  ;;  %988 = vmatpush.msra.mxu2 %v511_v34  ;;  %v504_v45 = vsel %vm502_vm2, 16711935, %v1226_v4 }
  0xa3   : > { %v481_v38 = vpop.permute.xlu0 %480  ;;  %v476_v39 = vpop.permute.xlu1 %475 }
  0xa4   : > { %v494_v40 = vadd.f32 %v481_v38, %v466_v37  ;;  %v493_v41 = vadd.f32 %v476_v39, %v465_v36 }
  0xa6   : > { %vm498_vm3 = vcmp.gt.f32.partialorder %v494_v40, 0.0  ;;  %vm497_vm4 = vcmp.gt.f32.partialorder %v493_v41, 0.0  ;;  %v510_v42 = vmax.f32 %v494_v40, 0.0  ;;  %v509_v46 = vmax.f32 %v493_v41, 0.0 }
  0xa7   : > { %vm501_vm5 = vmpackc.low %vm498_vm3, %vm497_vm4 }
  0xa8   : > { %v503_v44 = vsel %vm501_vm5, 16711935, %v1226_v4  ;;  %568 = vmatpush.msra.mxu0 %v510_v42  ;;  %989 = vmatpush.msra.mxu2 %v510_v42 }
  0xa9   : > { %v505_v48 = vpack.c.b8 %v504_v45, %v503_v44 }
  0xaa   : > { %569 = vmatpush.msra.mxu0 %v509_v46  ;;  %990 = vmatpush.msra.mxu2 %v509_v46 }
  0xab   : > { %971 = vmatmul.msk.f32.vlgmr.msra.gmra.mxu0 %vm541_vm6, %v513_v43  ;;  %973 = vmatmul.msk.f32.vlgmr.msra.gmra.mxu2 %vm541_vm6, %v515_v47  ;;  %vm506_vm7 = vnez %v505_v48  ;;  %v534_v54 = vpop.permute.xlu0 %533  ;;  %v529_v57 = vpop.permute.xlu1 %528 }
  0xac   : > { %v507_v49 = vsel %vm506_vm7, 16843009, %v1226_v4 }
  0xad   : > { %508 = vst [vmem:[%s417_s17] sm:$0xff] %v507_v49 }
  0xb3   : > { %972 = vmatmul.msk.f32.gmra.mxu0 %vm541_vm6, %v514_v50  ;;  %974 = vmatmul.msk.f32.gmra.mxu2 %vm541_vm6, %v516_v51 }
 0x128   : > { %v571_v53 = vpop.f32.mrf.mxu0 }
 0x129   : > { %v572_v61 = vadd.f32 %v571_v53, %v524_v59 }
 0x12b   : > { %v595_v0 = vsub.f32 0.0, %v572_v61  ;;  %vm583_vm9 = vcmp.gt.f32.partialorder %v572_v61, 0.0 }
 0x12d   : > { %v599_v7 = vmul.f32 1.442695, %v595_v0 }
 0x12e   : > { %v577_v55 = vpop.f32.mrf.mxu2 }
 0x12f   : > { %v578_v56 = vadd.f32 %v577_v55, %v534_v54 }
 0x130   : > { %v574_v58 = vpop.f32.mrf.mxu0 }
 0x131   : > { %v575_v60 = vadd.f32 %v574_v58, %v529_v57  ;;  %v597_v62 = vsub.f32 0.0, %v578_v56  ;;  %vm585_vm11 = vcmp.gt.f32.partialorder %v578_v56, 0.0 }
 0x133   : > { %v596_v63 = vsub.f32 0.0, %v575_v60  ;;  %vm584_vm8 = vcmp.gt.f32.partialorder %v575_v60, 0.0  ;;  %v603_v2 = vmul.f32 1.442695, %v597_v62 }
 0x134   : > { %vm587_vm10 = vmpackc.low %vm584_vm8, %vm583_vm9 }
 0x135   : > { %v601_v5 = vmul.f32 1.442695, %v596_v63  ;;  %1054 = vpow2.f32 %v603_v2  ;;  %v589_v8 = vsel %vm587_vm10, 16711935, %v1226_v4 }
 0x136   : > { %v580_v1 = vpop.f32.mrf.mxu2 }
 0x137   : > { %v581_v3 = vadd.f32 %v580_v1, %v539_v52  ;;  %1056 = vpow2.f32 %v601_v5 }
 0x139   : > { %vm586_vm12 = vcmp.gt.f32.partialorder %v581_v3, 0.0  ;;  %v598_v6 = vsub.f32 0.0, %v581_v3 }
 0x13a   : > { %vm588_vm13 = vmpackc.low %vm586_vm12, %vm585_vm11 }
 0x13b   : > { %v590_v9 = vsel %vm588_vm13, 16711935, %v1226_v4  ;;  %v605_v10 = vmul.f32 1.442695, %v598_v6  ;;  %v1055_v13 = vpop.eup %1054 }
 0x13c   : > { %v591_v11 = vpack.c.b8 %v590_v9, %v589_v8  ;;  %v609_v16 = vadd.f32 1.0, %v1055_v13 }
 0x13d   : > { %1058 = vpow2.f32 %v605_v10  ;;  %v1057_v14 = vpop.eup %1056 }
 0x13e   : > { %vm592_vm14 = vnez %v591_v11  ;;  %1060 = vpow2.f32 %v599_v7  ;;  %v608_v19 = vadd.f32 1.0, %v1057_v14 }
 0x13f   : > { %v593_v12 = vsel %vm592_vm14, 16843009, %v1226_v4 }
 0x140   : > { %594 = vst [vmem:[%s1580_s21] sm:$0xff] %v593_v12  ;;  %s784_s21 = scalar_lea.hbm %s1575_s10, %s1473_s25 }
 0x141   : > { %s788_s27 = sshll.u32 %s784_s21, 4  ;;  %s789_s27 = int_to_ptr.hbm [resolvable:$true] %s788_s27 }
 0x142   : > { %s1084_s20 = sshra.s32 %s789_s27, 4  ;;  %s1085_s20 = int_to_ptr.hbm [resolvable:$true] %s1084_s20 }
 0x143   : > { %v1059_v15 = vpop.eup %1058  ;;  %s1086_s0 = scalar_lea.hbm %s1085_s20, 8  ;;  %p1091_p0 = scmp.lt.s32.totalorder %s1085_s20, %s1575_s10 }
 0x144   : > { %v610_v17 = vadd.f32 1.0, %v1059_v15  ;;  %v1061_v18 = vpop.eup %1060  ;;  %p1087_p11 = scmp.ne.s32.totalorder %s1085_s20, %s1086_s0  ;;  %p1092_p1 = scmp.lt.s32.totalorder %s1090_s3, %s1086_s0 }
 0x145   : > { %v607_v20 = vadd.f32 1.0, %v1061_v18 }
 0x146   : > { %1062 = vrcp.f32 %v610_v17  ;;  %p1088_p12 = pnand %p1087_p11, %p1335_p5  ;;  %p1093_p2 = por %p1092_p1, %p1091_p0 }
 0x147   : > { %1064 = vrcp.f32 %v609_v16 }
 0x148   : > { %1066 = vrcp.f32 %v608_v19  ;;  %p1089_p13 = pneg %p1088_p12 }
 0x149   : > { %1068 = vrcp.f32 %v607_v20 }
 0x14a   : > { %p1094_p3 = pnand %p1093_p2, %p1089_p13 }
 0x14c   : > { %v1063_v21 = vpop.eup %1062 }
 0x14d   : > { %667 = vmatpush.msra.mxu1 %v1063_v21  ;;  %991 = vmatpush.msra.mxu3 %v1063_v21  ;;  %v1065_v22 = vpop.eup %1064 }
 0x14e   : > { %v1067_v23 = vpop.eup %1066 }
 0x14f   : > { %668 = vmatpush.msra.mxu1 %v1065_v22  ;;  %992 = vmatpush.msra.mxu3 %v1065_v22  ;;  %v1069_v26 = vpop.eup %1068 }
 0x151   : > { %669 = vmatpush.msra.mxu1 %v1067_v23  ;;  %993 = vmatpush.msra.mxu3 %v1067_v23 }
 0x153   : > { %670 = vmatpush.msra.mxu1 %v1069_v26  ;;  %994 = vmatpush.msra.mxu3 %v1069_v26 }
 0x154   : > { %975 = vmatmul.msk.f32.vlgmr.msra.gmra.mxu1 %vm541_vm6, %v615_v24  ;;  %977 = vmatmul.msk.f32.vlgmr.msra.gmra.mxu3 %vm541_vm6, %v617_v25 }
 0x15c   : > { %976 = vmatmul.msk.f32.gmra.mxu1 %vm541_vm6, %v616_v27  ;;  %978 = vmatmul.msk.f32.gmra.mxu3 %vm541_vm6, %v618_v28 }
 0x15d   : > { %1097 = shalt.err (!%p1094_p3)
}
 0x15e   : > { %996 = dma.vmem_to_hbm [thread:$0]  (%p1335_p5), %s787_s18, 128, %s789_s27, %s1481_s19  }
 0x15f   : > { %s798_s1 = scalar_lea.hbm %s1576_s11, %s1473_s25  ;;  %s1595_s2 = scalar_lea.vmem [#allocation7], %s1428_s13 }
 0x160   : > { %s800_s16 = sshll.u32 %s1595_s2, 4  ;;  %s802_s29 = sshll.u32 %s798_s1, 4  ;;  %s801_s16 = int_to_ptr.vmem [resolvable:$true] %s800_s16  ;;  %s803_s29 = int_to_ptr.hbm [resolvable:$true] %s802_s29 }
 0x161   : > { %s1112_s0 = sshra.s32 %s803_s29, 4  ;;  %s1118_s18 = scalar_lea.hbm %s1576_s11, 16  ;;  %s1113_s0 = int_to_ptr.hbm [resolvable:$true] %s1112_s0 }
 0x162   : > { %s1114_s3 = scalar_lea.hbm %s1113_s0, 8  ;;  %p1119_p9 = scmp.lt.s32.totalorder %s1113_s0, %s1576_s11 }
 0x163   : > { %p1115_p4 = scmp.ne.s32.totalorder %s1113_s0, %s1114_s3  ;;  %p1120_p10 = scmp.lt.s32.totalorder %s1118_s18, %s1114_s3 }
 0x165   : > { %p1116_p7 = pnand %p1115_p4, %p1335_p5  ;;  %p1121_p11 = por %p1120_p10, %p1119_p9 }
 0x167   : > { %p1117_p8 = pneg %p1116_p7 }
 0x169   : > { %p1122_p12 = pnand %p1121_p11, %p1117_p8 }
 0x16b   : > { %1125 = shalt.err (!%p1122_p12)
}
 0x16c   : > { %997 = dma.vmem_to_hbm [thread:$0]  (%p1335_p5), %s801_s16, 128, %s803_s29, %s1481_s19   ;;  %v626_v29 = vpop.permute.xlu0 %625  ;;  %v631_v30 = vpop.permute.xlu1 %630 }
 0x16d   : > { %v636_v32 = vpop.permute.xlu2 %635  ;;  %s812_s17 = scalar_lea.hbm %s1577_s12, %s1473_s25  ;;  %s431_s21 = scalar_lea.vmem [#allocation8], %s1428_s13 }
 0x16e   : > { %s814_s1 = sshll.u32 %s431_s21, 4  ;;  %s816_s2 = sshll.u32 %s812_s17, 4  ;;  %s815_s1 = int_to_ptr.vmem [resolvable:$true] %s814_s1  ;;  %s817_s2 = int_to_ptr.hbm [resolvable:$true] %s816_s2 }
 0x16f   : > { %s761_s25 = scalar_lea.sflag [#allocation9], %s1422_s22  ;;  %s1140_s16 = sshra.s32 %s817_s2, 4  ;;  %s1141_s16 = int_to_ptr.hbm [resolvable:$true] %s1140_s16 }
 0x170   : > { %s1142_s29 = scalar_lea.hbm %s1141_s16, 8  ;;  %s1146_s3 = scalar_lea.hbm %s1577_s12, 16 }
 0x171   : > { %p1143_p13 = scmp.ne.s32.totalorder %s1141_s16, %s1142_s29  ;;  %p1147_p2 = scmp.lt.s32.totalorder %s1141_s16, %s1577_s12 }
 0x172   : > { %p1148_p3 = scmp.lt.s32.totalorder %s1146_s3, %s1142_s29 }
 0x173   : > { %p1144_p0 = pnand %p1143_p13, %p1335_p5 }
 0x174   : > { %v641_v34 = vpop.permute.xlu0 %640  ;;  %v707_v36 = vpop.permute.xlu1 %706  ;;  %p1149_p4 = por %p1148_p3, %p1147_p2 }
 0x175   : > { %v712_v42 = vpop.permute.xlu2 %711  ;;  %p1145_p1 = pneg %p1144_p0 }
 0x177   : > { %p1150_p7 = pnand %p1149_p4, %p1145_p1 }
 0x17c   : > { %v717_v49 = vpop.permute.xlu0 %716  ;;  %v722_v52 = vpop.permute.xlu1 %721 }
 0x1d1   : > { %v672_v31 = vpop.f32.mrf.mxu1 }
 0x1d2   : > { %v673_v33 = vadd.f32 %v672_v31, %v626_v29 }
 0x1d4   : > { %v696_v38 = vmax.f32 %v673_v33, 0.0  ;;  %vm684_vm0 = vcmp.gt.f32.partialorder %v673_v33, 0.0 }
 0x1d6   : > { %v724_v43 = vmul.f32 %v707_v36, %v696_v38 }
 0x1d7   : > { %v678_v35 = vpop.f32.mrf.mxu3 }
 0x1d8   : > { %v679_v39 = vadd.f32 %v678_v35, %v636_v32 }
 0x1d9   : > { %v675_v37 = vpop.f32.mrf.mxu1 }
 0x1da   : > { %v676_v40 = vadd.f32 %v675_v37, %v631_v30  ;;  %v698_v44 = vmax.f32 %v679_v39, 0.0  ;;  %vm686_vm2 = vcmp.gt.f32.partialorder %v679_v39, 0.0 }
 0x1dc   : > { %v697_v41 = vmax.f32 %v676_v40, 0.0  ;;  %vm685_vm15 = vcmp.gt.f32.partialorder %v676_v40, 0.0  ;;  %v726_v50 = vmul.f32 %v717_v49, %v698_v44 }
 0x1dd   : > { %vm688_vm1 = vmpackc.low %vm685_vm15, %vm684_vm0 }
 0x1de   : > { %v725_v45 = vmul.f32 %v712_v42, %v697_v41  ;;  %v690_v53 = vsel %vm688_vm1, 16711935, %v1226_v4 }
 0x1df   : > { %v681_v46 = vpop.f32.mrf.mxu3 }
 0x1e0   : > { %v728_v47 = vadd.f32 %v725_v45, %v724_v43  ;;  %v682_v48 = vadd.f32 %v681_v46, %v641_v34 }
 0x1e2   : > { %vm687_vm3 = vcmp.gt.f32.partialorder %v682_v48, 0.0  ;;  %v699_v51 = vmax.f32 %v682_v48, 0.0  ;;  %v729_v56 = vadd.f32 %v728_v47, %v726_v50 }
 0x1e3   : > { %vm689_vm4 = vmpackc.low %vm687_vm3, %vm686_vm2 }
 0x1e4   : > { %v691_v54 = vsel %vm689_vm4, 16711935, %v1226_v4  ;;  %v727_v55 = vmul.f32 %v722_v52, %v699_v51 }
 0x1e5   : > { %v692_v57 = vpack.c.b8 %v691_v54, %v690_v53 }
 0x1e6   : > { %v730_v58 = vadd.f32 %v729_v56, %v727_v55 }
 0x1e7   : > { %vm693_vm5 = vnez %v692_v57 }
 0x1e8   : > { %v731_v59 = vrot.slane %v730_v58, 4  ;;  %v694_v60 = vsel %vm693_vm5, 16843009, %v1226_v4 }
 0x1e9   : > { %695 = vst [vmem:[%s431_s21] sm:$0xff] %v694_v60 }
 0x1ea   : > { %v732_v61 = vadd.f32 %v731_v59, %v730_v58 }
 0x1eb   : > { %1153 = shalt.err (!%p1150_p7)
}
 0x1ec   : > { %998 = dma.vmem_to_hbm [thread:$0]  (%p1335_p5), %s815_s1, 128, %s817_s2, %s761_s25   ;;  %v733_v4 = vrot.slane %v732_v61, 2  ;;  %v741_v63 = vpop.permute.xlu2 %740 }
 0x1ed   : > { %s770_s4 = scalar_lea.hbm %s1574_s9, %s1316_s8  ;;  %s410_s19 = scalar_lea.vmem [#allocation3], %s1422_s22  ;;  %v743_v1 = vperm.slane %v741_v63, 0 }
 0x1ee   : > { %v734_v62 = vadd.f32 %v733_v4, %v732_v61  ;;  %s772_s17 = sshll.u32 %s410_s19, 4  ;;  %s774_s21 = sshll.u32 %s770_s4, 4  ;;  %s773_s17 = int_to_ptr.vmem [resolvable:$true] %s772_s17  ;;  %s775_s21 = int_to_ptr.hbm [resolvable:$true] %s774_s21 }
 0x1ef   : > { %s747_s16 = scalar_lea.sflag [#allocation4], %s1422_s22  ;;  %s1168_s1 = sshra.s32 %s775_s21, 4  ;;  %s1169_s1 = int_to_ptr.hbm [resolvable:$true] %s1168_s1 }
 0x1f0   : > { %v735_v0 = vrot.slane %v734_v62, 1  ;;  %s1170_s2 = scalar_lea.hbm %s1169_s1, 1  ;;  %s1174_s29 = scalar_lea.hbm %s1574_s9, 2 }
 0x1f1   : > { %p1171_p8 = scmp.ne.s32.totalorder %s1169_s1, %s1170_s2  ;;  %p1175_p11 = scmp.lt.s32.totalorder %s1169_s1, %s1574_s9 }
 0x1f2   : > { %v736_v2 = vadd.f32 %v735_v0, %v734_v62  ;;  %p1176_p12 = scmp.lt.s32.totalorder %s1174_s29, %s1170_s2 }
 0x1f3   : > { %p1172_p9 = pnand %p1171_p8, %p1335_p5 }
 0x1f4   : > { %v744_v3 = vadd.f32 %v743_v1, %v736_v2  ;;  %p1177_p13 = por %p1176_p12, %p1175_p11 }
 0x1f5   : > { %p1173_p10 = pneg %p1172_p9 }
 0x1f6   : > { %745 = vst [vmem:[%s410_s19] sm:$0x1] %v744_v3 }
 0x1f7   : > { %p1178_p0 = pnand %p1177_p13, %p1173_p10 }
 0x1f9   : > { %1181 = shalt.err (!%p1178_p0)
}
 0x1fa   : > { %995 = dma.vmem_to_hbm [thread:$0]  (%p1335_p5), %s773_s17, 16, %s775_s21, %s747_s16  }
 0x1fb PF: > { %p1016_p1 = scmp.ge.s32.totalorder %s1224_s26, 2  ;;  %s828_s22 = sand.u32 1, %s1212_s23  }
 0x1fc   : > { %s829_s3 = scalar_lea.sflag [#allocation4], %s828_s22 }
 0x1fd   : > { %p1004_p2 = pnand %p1016_p1, %p1339_p6 }
 0x1ff   : > { %p1005_p3 = pneg %p1004_p2 }
 0x201   : > { %1199 = dma.done.wait (%p1005_p3), %s829_s3, 16  }
 0x202   : > { %1201 = vsyncadd (%p1005_p3), %s829_s3, 4294967280  ;;  %s1596_s20 = sadd.s32 4294967294, %s1224_s26  }
 0x203   : > { %s837_s30 = sand.u32 1, %s1596_s20  }
 0x204   : > { %s838_s18 = scalar_lea.sflag [#allocation6], %s837_s30 }
 0x205   : > { %1203 = dma.done.wait (%p1005_p3), %s838_s18, 256  }
 0x206   : > { %1205 = vsyncadd (%p1005_p3), %s838_s18, 4294967040  ;;  %s858_s14 = scalar_lea.sflag [#allocation9], %s828_s22 }
 0x207   : > { %1207 = dma.done.wait (%p1005_p3), %s858_s14, 128  }
 0x208   : > { %1209 = vsyncadd (%p1005_p3), %s858_s14, 4294967168  ;;  %s1597_s27 = sld [smem:[#allocation13_spill]]  ;;  %p31_p5 = scmp.ge.s32.totalorder %s1320_s28, 4  }
 0x209   : > { %s1598_s25 = sld [smem:[#allocation14_spill]]  ;;  %s1599_s23 = smov %s1216_s24 }
 0x20a   : > { %s1601_s26 = smov %s1320_s28  ;;  %33 = sbr.rel (!%p31_p5) target bundleno = 13 (0xd), region = 140 }
 0x20e   : > { %s1600_s24 = smov %s1597_s27 }
 0x20f   :  { %864 = vsyncpa [#allocation4], 1 }
 0x210   :  { %866 = vsyncpa [#allocation4 + $0x1], 1 }
 0x211   :  { %867 = vsyncpa [#allocation6], 1 }
 0x212   :  { %869 = vsyncpa [#allocation6 + $0x1], 1 }
 0x213   :  { %870 = vsyncpa [#allocation9], 1 }
 0x214   :  { %872 = vsyncpa [#allocation9 + $0x1], 1 }

</bundles_post_ra>
